<compile_context>
chip_gen: v5e
topology: v5e:2x2
jax: 0.10.0
libtpu: 0.0.40
codegen_flags: <defaults>
</compile_context>

<pallas_src>
import jax
import jax.numpy as jnp
from jax.experimental import pallas as pl
from jax.experimental.pallas import tpu as pltpu


def _make_rcb_kernel(H, W, C, CP):
    HW = H * W
    HALO = 128  # aligned zero halo on each side of the flattened spatial axis

    def kernel(x_ref, w1_ref, b1_ref, w2_ref, b2_ref, o_ref, patch_ref):
        # x_ref:     (C, H*W)    one batch element, flattened spatial on lanes
        # w*_ref:    (CP, 9*C)   im2col weight matrix, C_out rows padded to CP=8
        # b*_ref:    (CP, 1)     bias column
        # o_ref:     (C, H*W)    output block (lane-dense store, H*W lanes)
        # patch_ref: (9*C, H*W)  VMEM im2col staging buffer
        x = x_ref[...]  # (C, HW) f32

        # Column index of every flattened position (hoisted; reused by both convs)
        # to mask taps that would read across the left/right image border.
        col = jax.lax.broadcasted_iota(jnp.int32, (C, HW), 1) % W
        ok_left = col >= 1           # source column x-1 exists
        ok_right = col <= W - 2      # source column x+1 exists

        def im2col(act):
            # act: (C, HW) -> (9*C, HW) patch matrix for a 3x3 / pad=1 conv.
            # The zero halo provides top/bottom padding for free and is built
            # in-register with a 128-lane-aligned concat (no scratch round-trip).
            zeros = jnp.zeros((C, HALO), jnp.float32)
            halo = jnp.concatenate([zeros, act, zeros], axis=1)  # (C, HW + 2*HALO)
            k = 0
            for dy in (-1, 0, 1):
                for dx in (-1, 0, 1):
                    s = dy * W + dx
                    tap = halo[:, HALO + s: HALO + s + HW]       # shifted by (dy, dx)
                    if dx == -1:
                        tap = jnp.where(ok_left, tap, 0.0)
                    elif dx == 1:
                        tap = jnp.where(ok_right, tap, 0.0)
                    # Full-lane (HW-wide) store into the staging buffer.
                    patch_ref[k * C:(k + 1) * C, :] = tap
                    k += 1
            return patch_ref[...]                                # (9*C, HW)

        # conv1 -> ReLU : a single MXU matmul, K = 9*C, N = HW lanes.
        p1 = im2col(x)
        h1 = jnp.dot(w1_ref[...], p1, preferred_element_type=jnp.float32)
        h1 = jnp.maximum(h1 + b1_ref[...], 0.0)                  # (CP, HW)

        # conv2 : same fused matmul on the ReLU output (valid channel rows only).
        p2 = im2col(h1[:C, :])
        h2 = jnp.dot(w2_ref[...], p2, preferred_element_type=jnp.float32)
        h2 = h2 + b2_ref[...]

        # residual: out = conv2 * 0.1 + identity  (lane-dense 256-wide store)
        o_ref[...] = (h2[:C, :] * jnp.float32(0.1) + x).astype(o_ref.dtype)

    return kernel


def residual_conv_block(x_nchw, w1, b1, w2, b2):
    """x_nchw: (N, C, H, W) f32; w*: torch-style OIHW (C, C, 3, 3); b*: (C,)."""
    N, C, H, W = x_nchw.shape
    HW = H * W
    CP = ((C + 7) // 8) * 8  # pad the C_out (sublane) dim of the weights to 8

    # Free, contiguous view: NCHW -> (N, C, H*W).  No pad / transpose materialized.
    x_flat = x_nchw.reshape(N, C, HW)

    def prep_w(w):
        # OIHW -> (C_out, ky, kx, C_in) -> (C_out, 9*C_in); rows zero-padded to CP.
        wm = jnp.transpose(w, (0, 2, 3, 1)).reshape(C, 9 * C)
        return jnp.pad(wm, ((0, CP - C), (0, 0)))

    w1m, w2m = prep_w(w1), prep_w(w2)
    b1c = jnp.pad(b1, (0, CP - C)).reshape(CP, 1)
    b2c = jnp.pad(b2, (0, CP - C)).reshape(CP, 1)

    kernel = _make_rcb_kernel(H, W, C, CP)

    out_flat = pl.pallas_call(
        kernel,
        out_shape=jax.ShapeDtypeStruct((N, C, HW), x_nchw.dtype),
        grid_spec=pltpu.PrefetchScalarGridSpec(
            num_scalar_prefetch=0,
            grid=(N,),  # N parallel steps -> both TensorCores on v7x
            in_specs=[
                pl.BlockSpec((None, C, HW), lambda n: (n, 0, 0)),
                pl.BlockSpec((CP, 9 * C), lambda n: (0, 0)),
                pl.BlockSpec((CP, 1), lambda n: (0, 0)),
                pl.BlockSpec((CP, 9 * C), lambda n: (0, 0)),
                pl.BlockSpec((CP, 1), lambda n: (0, 0)),
            ],
            out_specs=pl.BlockSpec((None, C, HW), lambda n: (n, 0, 0)),
            scratch_shapes=[pltpu.VMEM((9 * C, HW), jnp.float32)],
        ),
        compiler_params=pltpu.CompilerParams(
            dimension_semantics=("parallel",)),
    )(x_flat, w1m, b1c, w2m, b2c)

    return out_flat.reshape(N, C, H, W)  # free reshape back to NCHW


if __name__ == "__main__":
    key = jax.random.PRNGKey(0)
    kx, k1, kb1, k2, kb2 = jax.random.split(key, 5)

    N, C, H, W = 2, 4, 16, 16
    x = jax.random.normal(kx, (N, C, H, W), jnp.float32)

    # Deterministic Conv2d-style init (uniform in +/- 1/sqrt(fan_in)).
    fan_in = C * 3 * 3
    bound = 1.0 / (fan_in ** 0.5)
    w1 = jax.random.uniform(k1, (C, C, 3, 3), jnp.float32, -bound, bound)
    b1 = jax.random.uniform(kb1, (C,), jnp.float32, -bound, bound)
    w2 = jax.random.uniform(k2, (C, C, 3, 3), jnp.float32, -bound, bound)
    b2 = jax.random.uniform(kb2, (C,), jnp.float32, -bound, bound)

    out = jax.block_until_ready(residual_conv_block(x, w1, b1, w2, b2))

    # Pure-JAX reference (same semantics as the PyTorch module).
    def conv(inp, w, b):
        return jax.lax.conv_general_dilated(
            inp, w, (1, 1), ((1, 1), (1, 1)),
            dimension_numbers=("NCHW", "OIHW", "NCHW")) + b.reshape(1, -1, 1, 1)

    ref = conv(jnp.maximum(conv(x, w1, b1), 0.0), w2, b2) * 0.1 + x
    assert out.shape == (N, C, H, W) and out.dtype == jnp.float32
    assert jnp.allclose(out, ref, atol=1e-4, rtol=1e-4)
    print("KERNEL_OK")
</pallas_src>

<mosaic_0001>
module attributes {stable_mosaic.version = 11 : i64} {
  func.func @kernel(%arg0: i32, %arg1: memref<1x4x256xf32, #tpu.memory_space<vmem>>, %arg2: memref<8x36xf32, #tpu.memory_space<vmem>>, %arg3: memref<8x1xf32, #tpu.memory_space<vmem>>, %arg4: memref<8x36xf32, #tpu.memory_space<vmem>>, %arg5: memref<8x1xf32, #tpu.memory_space<vmem>>, %arg6: memref<1x4x256xf32, #tpu.memory_space<vmem>>, %arg7: memref<36x256xf32, #tpu.memory_space<vmem>>) attributes {dimension_semantics = [#tpu.dimension_semantics<parallel>], iteration_bounds = array<i64: 2>, scalar_prefetch = 0 : i64, scratch_operands = 1 : i64, tpu.core_type = #tpu.core_type<tc>, window_params = [{transform_indices = @transform_0, window_bounds = array<i64: 1, 4, 256>}, {pipeline_mode = #tpu.pipeline_mode<synchronous>, transform_indices = @transform_1, window_bounds = array<i64: 8, 36>}, {pipeline_mode = #tpu.pipeline_mode<synchronous>, transform_indices = @transform_2, window_bounds = array<i64: 8, 1>}, {pipeline_mode = #tpu.pipeline_mode<synchronous>, transform_indices = @transform_3, window_bounds = array<i64: 8, 36>}, {pipeline_mode = #tpu.pipeline_mode<synchronous>, transform_indices = @transform_4, window_bounds = array<i64: 8, 1>}, {transform_indices = @transform_5, window_bounds = array<i64: 1, 4, 256>}]} {
    %c0 = arith.constant 0 : index
    %c0_0 = arith.constant 0 : index
    %c0_1 = arith.constant 0 : index
    %0 = vector.load %arg1[%c0, %c0_0, %c0_1] : memref<1x4x256xf32, #tpu.memory_space<vmem>>, vector<1x4x256xf32>
    %1 = vector.shape_cast %0 : vector<1x4x256xf32> to vector<4x256xf32>
    %2 = tpu.iota {dimensions = array<i32: 1>} : vector<4x256xi32>
    %c16_i32 = arith.constant 16 : i32
    %c0_i32 = arith.constant 0 : i32
    %3 = arith.cmpi eq, %c16_i32, %c0_i32 : i32
    %c1_i32 = arith.constant 1 : i32
    %4 = arith.select %3, %c1_i32, %c16_i32 : i32
    %5 = vector.broadcast %4 : i32 to vector<4x256xi32>
    %6 = arith.remsi %2, %5 : vector<4x256xi32>
    %c0_i32_2 = arith.constant 0 : i32
    %7 = vector.broadcast %c0_i32_2 : i32 to vector<4x256xi32>
    %8 = arith.cmpi ne, %6, %7 : vector<4x256xi32>
    %c0_i32_3 = arith.constant 0 : i32
    %9 = vector.broadcast %c0_i32_3 : i32 to vector<4x256xi32>
    %10 = arith.cmpi slt, %6, %9 : vector<4x256xi32>
    %c0_i32_4 = arith.constant 0 : i32
    %11 = arith.cmpi slt, %4, %c0_i32_4 : i32
    %12 = vector.broadcast %11 : i1 to vector<4x256xi1>
    %13 = vector.broadcast %12 : vector<4x256xi1> to vector<4x256xi1>
    %14 = arith.xori %10, %13 : vector<4x256xi1>
    %15 = arith.andi %14, %8 : vector<4x256xi1>
    %16 = vector.broadcast %4 : i32 to vector<4x256xi32>
    %17 = arith.addi %6, %16 : vector<4x256xi32>
    %18 = arith.select %15, %17, %6 : vector<4x256xi1>, vector<4x256xi32>
    %c1_i32_5 = arith.constant 1 : i32
    %19 = vector.broadcast %c1_i32_5 : i32 to vector<4x256xi32>
    %20 = arith.cmpi sge, %18, %19 : vector<4x256xi32>
    %c14_i32 = arith.constant 14 : i32
    %21 = vector.broadcast %c14_i32 : i32 to vector<4x256xi32>
    %22 = arith.cmpi sle, %18, %21 : vector<4x256xi32>
    %cst = arith.constant 0.000000e+00 : f32
    %23 = vector.broadcast %cst : f32 to vector<4x128xf32>
    %24 = tpu.concatenate %23, %1, %23 in 1 : vector<4x128xf32>, vector<4x256xf32>, vector<4x128xf32> -> vector<4x512xf32>
    %25 = vector.extract_strided_slice %24 {offsets = [0, 111], sizes = [4, 256], strides = [1, 1]} : vector<4x512xf32> to vector<4x256xf32>
    %cst_6 = arith.constant 0.000000e+00 : f32
    %26 = vector.broadcast %cst_6 : f32 to vector<4x256xf32>
    %27 = arith.select %20, %25, %26 : vector<4x256xi1>, vector<4x256xf32>
    %c0_7 = arith.constant 0 : index
    %c0_8 = arith.constant 0 : index
    %28 = vector.load %arg7[%c0_7, %c0_8] : memref<36x256xf32, #tpu.memory_space<vmem>>, vector<4x256xf32>
    tpu.vector_store %arg7[%c0_7, %c0_8], %27 {strides = array<i32>} : memref<36x256xf32, #tpu.memory_space<vmem>>, vector<4x256xf32>,
    %29 = vector.extract_strided_slice %24 {offsets = [0, 112], sizes = [4, 256], strides = [1, 1]} : vector<4x512xf32> to vector<4x256xf32>
    %c4 = arith.constant 4 : index
    %c0_9 = arith.constant 0 : index
    %30 = vector.load %arg7[%c4, %c0_9] : memref<36x256xf32, #tpu.memory_space<vmem>>, vector<4x256xf32>
    tpu.vector_store %arg7[%c4, %c0_9], %29 {strides = array<i32>} : memref<36x256xf32, #tpu.memory_space<vmem>>, vector<4x256xf32>,
    %31 = vector.extract_strided_slice %24 {offsets = [0, 113], sizes = [4, 256], strides = [1, 1]} : vector<4x512xf32> to vector<4x256xf32>
    %cst_10 = arith.constant 0.000000e+00 : f32
    %32 = vector.broadcast %cst_10 : f32 to vector<4x256xf32>
    %33 = arith.select %22, %31, %32 : vector<4x256xi1>, vector<4x256xf32>
    %c8 = arith.constant 8 : index
    %c0_11 = arith.constant 0 : index
    %34 = vector.load %arg7[%c8, %c0_11] : memref<36x256xf32, #tpu.memory_space<vmem>>, vector<4x256xf32>
    tpu.vector_store %arg7[%c8, %c0_11], %33 {strides = array<i32>} : memref<36x256xf32, #tpu.memory_space<vmem>>, vector<4x256xf32>,
    %35 = vector.extract_strided_slice %24 {offsets = [0, 127], sizes = [4, 256], strides = [1, 1]} : vector<4x512xf32> to vector<4x256xf32>
    %cst_12 = arith.constant 0.000000e+00 : f32
    %36 = vector.broadcast %cst_12 : f32 to vector<4x256xf32>
    %37 = arith.select %20, %35, %36 : vector<4x256xi1>, vector<4x256xf32>
    %c12 = arith.constant 12 : index
    %c0_13 = arith.constant 0 : index
    %38 = vector.load %arg7[%c12, %c0_13] : memref<36x256xf32, #tpu.memory_space<vmem>>, vector<4x256xf32>
    tpu.vector_store %arg7[%c12, %c0_13], %37 {strides = array<i32>} : memref<36x256xf32, #tpu.memory_space<vmem>>, vector<4x256xf32>,
    %39 = vector.extract_strided_slice %24 {offsets = [0, 128], sizes = [4, 256], strides = [1, 1]} : vector<4x512xf32> to vector<4x256xf32>
    %c16 = arith.constant 16 : index
    %c0_14 = arith.constant 0 : index
    %40 = vector.load %arg7[%c16, %c0_14] : memref<36x256xf32, #tpu.memory_space<vmem>>, vector<4x256xf32>
    tpu.vector_store %arg7[%c16, %c0_14], %39 {strides = array<i32>} : memref<36x256xf32, #tpu.memory_space<vmem>>, vector<4x256xf32>,
    %41 = vector.extract_strided_slice %24 {offsets = [0, 129], sizes = [4, 256], strides = [1, 1]} : vector<4x512xf32> to vector<4x256xf32>
    %cst_15 = arith.constant 0.000000e+00 : f32
    %42 = vector.broadcast %cst_15 : f32 to vector<4x256xf32>
    %43 = arith.select %22, %41, %42 : vector<4x256xi1>, vector<4x256xf32>
    %c20 = arith.constant 20 : index
    %c0_16 = arith.constant 0 : index
    %44 = vector.load %arg7[%c20, %c0_16] : memref<36x256xf32, #tpu.memory_space<vmem>>, vector<4x256xf32>
    tpu.vector_store %arg7[%c20, %c0_16], %43 {strides = array<i32>} : memref<36x256xf32, #tpu.memory_space<vmem>>, vector<4x256xf32>,
    %45 = vector.extract_strided_slice %24 {offsets = [0, 143], sizes = [4, 256], strides = [1, 1]} : vector<4x512xf32> to vector<4x256xf32>
    %cst_17 = arith.constant 0.000000e+00 : f32
    %46 = vector.broadcast %cst_17 : f32 to vector<4x256xf32>
    %47 = arith.select %20, %45, %46 : vector<4x256xi1>, vector<4x256xf32>
    %c24 = arith.constant 24 : index
    %c0_18 = arith.constant 0 : index
    %48 = vector.load %arg7[%c24, %c0_18] : memref<36x256xf32, #tpu.memory_space<vmem>>, vector<4x256xf32>
    tpu.vector_store %arg7[%c24, %c0_18], %47 {strides = array<i32>} : memref<36x256xf32, #tpu.memory_space<vmem>>, vector<4x256xf32>,
    %49 = vector.extract_strided_slice %24 {offsets = [0, 144], sizes = [4, 256], strides = [1, 1]} : vector<4x512xf32> to vector<4x256xf32>
    %c28 = arith.constant 28 : index
    %c0_19 = arith.constant 0 : index
    %50 = vector.load %arg7[%c28, %c0_19] : memref<36x256xf32, #tpu.memory_space<vmem>>, vector<4x256xf32>
    tpu.vector_store %arg7[%c28, %c0_19], %49 {strides = array<i32>} : memref<36x256xf32, #tpu.memory_space<vmem>>, vector<4x256xf32>,
    %51 = vector.extract_strided_slice %24 {offsets = [0, 145], sizes = [4, 256], strides = [1, 1]} : vector<4x512xf32> to vector<4x256xf32>
    %cst_20 = arith.constant 0.000000e+00 : f32
    %52 = vector.broadcast %cst_20 : f32 to vector<4x256xf32>
    %53 = arith.select %22, %51, %52 : vector<4x256xi1>, vector<4x256xf32>
    %c32 = arith.constant 32 : index
    %c0_21 = arith.constant 0 : index
    %54 = vector.load %arg7[%c32, %c0_21] : memref<36x256xf32, #tpu.memory_space<vmem>>, vector<4x256xf32>
    tpu.vector_store %arg7[%c32, %c0_21], %53 {strides = array<i32>} : memref<36x256xf32, #tpu.memory_space<vmem>>, vector<4x256xf32>,
    %c0_22 = arith.constant 0 : index
    %c0_23 = arith.constant 0 : index
    %55 = vector.load %arg7[%c0_22, %c0_23] : memref<36x256xf32, #tpu.memory_space<vmem>>, vector<36x256xf32>
    %c0_24 = arith.constant 0 : index
    %c0_25 = arith.constant 0 : index
    %56 = vector.load %arg2[%c0_24, %c0_25] : memref<8x36xf32, #tpu.memory_space<vmem>>, vector<8x36xf32>
    %cst_26 = arith.constant dense<0.000000e+00> : vector<8x256xf32>
    %57 = tpu.matmul %56, %55, %cst_26 {dimension_numbers = #tpu.dot_dimension_numbers<[1], [0], [0], [1], [0, 0, 1, 1], [], []>} : vector<8x36xf32>, vector<36x256xf32>, vector<8x256xf32> -> vector<8x256xf32>
    %c0_27 = arith.constant 0 : index
    %c0_28 = arith.constant 0 : index
    %58 = vector.load %arg3[%c0_27, %c0_28] : memref<8x1xf32, #tpu.memory_space<vmem>>, vector<8x1xf32>
    %59 = vector.broadcast %58 : vector<8x1xf32> to vector<8x256xf32>
    %60 = arith.addf %57, %59 : vector<8x256xf32>
    %cst_29 = arith.constant 0.000000e+00 : f32
    %61 = vector.broadcast %cst_29 : f32 to vector<8x256xf32>
    %62 = arith.maximumf %60, %61 : vector<8x256xf32>
    %63 = vector.extract_strided_slice %62 {offsets = [0, 0], sizes = [4, 256], strides = [1, 1]} : vector<8x256xf32> to vector<4x256xf32>
    %cst_30 = arith.constant 0.000000e+00 : f32
    %64 = vector.broadcast %cst_30 : f32 to vector<4x128xf32>
    %65 = tpu.concatenate %64, %63, %64 in 1 : vector<4x128xf32>, vector<4x256xf32>, vector<4x128xf32> -> vector<4x512xf32>
    %66 = vector.extract_strided_slice %65 {offsets = [0, 111], sizes = [4, 256], strides = [1, 1]} : vector<4x512xf32> to vector<4x256xf32>
    %cst_31 = arith.constant 0.000000e+00 : f32
    %67 = vector.broadcast %cst_31 : f32 to vector<4x256xf32>
    %68 = arith.select %20, %66, %67 : vector<4x256xi1>, vector<4x256xf32>
    %c0_32 = arith.constant 0 : index
    %c0_33 = arith.constant 0 : index
    %69 = vector.load %arg7[%c0_32, %c0_33] : memref<36x256xf32, #tpu.memory_space<vmem>>, vector<4x256xf32>
    tpu.vector_store %arg7[%c0_32, %c0_33], %68 {strides = array<i32>} : memref<36x256xf32, #tpu.memory_space<vmem>>, vector<4x256xf32>,
    %70 = vector.extract_strided_slice %65 {offsets = [0, 112], sizes = [4, 256], strides = [1, 1]} : vector<4x512xf32> to vector<4x256xf32>
    %c4_34 = arith.constant 4 : index
    %c0_35 = arith.constant 0 : index
    %71 = vector.load %arg7[%c4_34, %c0_35] : memref<36x256xf32, #tpu.memory_space<vmem>>, vector<4x256xf32>
    tpu.vector_store %arg7[%c4_34, %c0_35], %70 {strides = array<i32>} : memref<36x256xf32, #tpu.memory_space<vmem>>, vector<4x256xf32>,
    %72 = vector.extract_strided_slice %65 {offsets = [0, 113], sizes = [4, 256], strides = [1, 1]} : vector<4x512xf32> to vector<4x256xf32>
    %cst_36 = arith.constant 0.000000e+00 : f32
    %73 = vector.broadcast %cst_36 : f32 to vector<4x256xf32>
    %74 = arith.select %22, %72, %73 : vector<4x256xi1>, vector<4x256xf32>
    %c8_37 = arith.constant 8 : index
    %c0_38 = arith.constant 0 : index
    %75 = vector.load %arg7[%c8_37, %c0_38] : memref<36x256xf32, #tpu.memory_space<vmem>>, vector<4x256xf32>
    tpu.vector_store %arg7[%c8_37, %c0_38], %74 {strides = array<i32>} : memref<36x256xf32, #tpu.memory_space<vmem>>, vector<4x256xf32>,
    %76 = vector.extract_strided_slice %65 {offsets = [0, 127], sizes = [4, 256], strides = [1, 1]} : vector<4x512xf32> to vector<4x256xf32>
    %cst_39 = arith.constant 0.000000e+00 : f32
    %77 = vector.broadcast %cst_39 : f32 to vector<4x256xf32>
    %78 = arith.select %20, %76, %77 : vector<4x256xi1>, vector<4x256xf32>
    %c12_40 = arith.constant 12 : index
    %c0_41 = arith.constant 0 : index
    %79 = vector.load %arg7[%c12_40, %c0_41] : memref<36x256xf32, #tpu.memory_space<vmem>>, vector<4x256xf32>
    tpu.vector_store %arg7[%c12_40, %c0_41], %78 {strides = array<i32>} : memref<36x256xf32, #tpu.memory_space<vmem>>, vector<4x256xf32>,
    %80 = vector.extract_strided_slice %65 {offsets = [0, 128], sizes = [4, 256], strides = [1, 1]} : vector<4x512xf32> to vector<4x256xf32>
    %c16_42 = arith.constant 16 : index
    %c0_43 = arith.constant 0 : index
    %81 = vector.load %arg7[%c16_42, %c0_43] : memref<36x256xf32, #tpu.memory_space<vmem>>, vector<4x256xf32>
    tpu.vector_store %arg7[%c16_42, %c0_43], %80 {strides = array<i32>} : memref<36x256xf32, #tpu.memory_space<vmem>>, vector<4x256xf32>,
    %82 = vector.extract_strided_slice %65 {offsets = [0, 129], sizes = [4, 256], strides = [1, 1]} : vector<4x512xf32> to vector<4x256xf32>
    %cst_44 = arith.constant 0.000000e+00 : f32
    %83 = vector.broadcast %cst_44 : f32 to vector<4x256xf32>
    %84 = arith.select %22, %82, %83 : vector<4x256xi1>, vector<4x256xf32>
    %c20_45 = arith.constant 20 : index
    %c0_46 = arith.constant 0 : index
    %85 = vector.load %arg7[%c20_45, %c0_46] : memref<36x256xf32, #tpu.memory_space<vmem>>, vector<4x256xf32>
    tpu.vector_store %arg7[%c20_45, %c0_46], %84 {strides = array<i32>} : memref<36x256xf32, #tpu.memory_space<vmem>>, vector<4x256xf32>,
    %86 = vector.extract_strided_slice %65 {offsets = [0, 143], sizes = [4, 256], strides = [1, 1]} : vector<4x512xf32> to vector<4x256xf32>
    %cst_47 = arith.constant 0.000000e+00 : f32
    %87 = vector.broadcast %cst_47 : f32 to vector<4x256xf32>
    %88 = arith.select %20, %86, %87 : vector<4x256xi1>, vector<4x256xf32>
    %c24_48 = arith.constant 24 : index
    %c0_49 = arith.constant 0 : index
    %89 = vector.load %arg7[%c24_48, %c0_49] : memref<36x256xf32, #tpu.memory_space<vmem>>, vector<4x256xf32>
    tpu.vector_store %arg7[%c24_48, %c0_49], %88 {strides = array<i32>} : memref<36x256xf32, #tpu.memory_space<vmem>>, vector<4x256xf32>,
    %90 = vector.extract_strided_slice %65 {offsets = [0, 144], sizes = [4, 256], strides = [1, 1]} : vector<4x512xf32> to vector<4x256xf32>
    %c28_50 = arith.constant 28 : index
    %c0_51 = arith.constant 0 : index
    %91 = vector.load %arg7[%c28_50, %c0_51] : memref<36x256xf32, #tpu.memory_space<vmem>>, vector<4x256xf32>
    tpu.vector_store %arg7[%c28_50, %c0_51], %90 {strides = array<i32>} : memref<36x256xf32, #tpu.memory_space<vmem>>, vector<4x256xf32>,
    %92 = vector.extract_strided_slice %65 {offsets = [0, 145], sizes = [4, 256], strides = [1, 1]} : vector<4x512xf32> to vector<4x256xf32>
    %cst_52 = arith.constant 0.000000e+00 : f32
    %93 = vector.broadcast %cst_52 : f32 to vector<4x256xf32>
    %94 = arith.select %22, %92, %93 : vector<4x256xi1>, vector<4x256xf32>
    %c32_53 = arith.constant 32 : index
    %c0_54 = arith.constant 0 : index
    %95 = vector.load %arg7[%c32_53, %c0_54] : memref<36x256xf32, #tpu.memory_space<vmem>>, vector<4x256xf32>
    tpu.vector_store %arg7[%c32_53, %c0_54], %94 {strides = array<i32>} : memref<36x256xf32, #tpu.memory_space<vmem>>, vector<4x256xf32>,
    %c0_55 = arith.constant 0 : index
    %c0_56 = arith.constant 0 : index
    %96 = vector.load %arg7[%c0_55, %c0_56] : memref<36x256xf32, #tpu.memory_space<vmem>>, vector<36x256xf32>
    %c0_57 = arith.constant 0 : index
    %c0_58 = arith.constant 0 : index
    %97 = vector.load %arg4[%c0_57, %c0_58] : memref<8x36xf32, #tpu.memory_space<vmem>>, vector<8x36xf32>
    %cst_59 = arith.constant dense<0.000000e+00> : vector<8x256xf32>
    %98 = tpu.matmul %97, %96, %cst_59 {dimension_numbers = #tpu.dot_dimension_numbers<[1], [0], [0], [1], [0, 0, 1, 1], [], []>} : vector<8x36xf32>, vector<36x256xf32>, vector<8x256xf32> -> vector<8x256xf32>
    %c0_60 = arith.constant 0 : index
    %c0_61 = arith.constant 0 : index
    %99 = vector.load %arg5[%c0_60, %c0_61] : memref<8x1xf32, #tpu.memory_space<vmem>>, vector<8x1xf32>
    %100 = vector.broadcast %99 : vector<8x1xf32> to vector<8x256xf32>
    %101 = arith.addf %98, %100 : vector<8x256xf32>
    %102 = vector.extract_strided_slice %101 {offsets = [0, 0], sizes = [4, 256], strides = [1, 1]} : vector<8x256xf32> to vector<4x256xf32>
    %cst_62 = arith.constant 1.000000e-01 : f32
    %103 = vector.broadcast %cst_62 : f32 to vector<4x256xf32>
    %104 = arith.mulf %102, %103 : vector<4x256xf32>
    %105 = arith.addf %104, %1 : vector<4x256xf32>
    %c0_63 = arith.constant 0 : index
    %c0_64 = arith.constant 0 : index
    %c0_65 = arith.constant 0 : index
    %106 = vector.load %arg6[%c0_63, %c0_64, %c0_65] : memref<1x4x256xf32, #tpu.memory_space<vmem>>, vector<1x4x256xf32>
    %107 = vector.shape_cast %106 : vector<1x4x256xf32> to vector<4x256xf32>
    %108 = vector.shape_cast %105 : vector<4x256xf32> to vector<1x4x256xf32>
    tpu.vector_store %arg6[%c0_63, %c0_64, %c0_65], %108 {strides = array<i32>} : memref<1x4x256xf32, #tpu.memory_space<vmem>>, vector<1x4x256xf32>,
    return
  }
  func.func @transform_0(%arg0: i32) -> (i32, i32, i32) {
    %c0_i32 = arith.constant 0 : i32
    %c0_i32_0 = arith.constant 0 : i32
    %c0_i32_1 = arith.constant 0 : i32
    return %arg0, %c0_i32, %c0_i32_0 : i32, i32, i32
  }
  func.func @transform_1(%arg0: i32) -> (i32, i32) {
    %c0_i32 = arith.constant 0 : i32
    %c0_i32_0 = arith.constant 0 : i32
    %c0_i32_1 = arith.constant 0 : i32
    return %c0_i32, %c0_i32_0 : i32, i32
  }
  func.func @transform_2(%arg0: i32) -> (i32, i32) {
    %c0_i32 = arith.constant 0 : i32
    %c0_i32_0 = arith.constant 0 : i32
    %c0_i32_1 = arith.constant 0 : i32
    return %c0_i32, %c0_i32_0 : i32, i32
  }
  func.func @transform_3(%arg0: i32) -> (i32, i32) {
    %c0_i32 = arith.constant 0 : i32
    %c0_i32_0 = arith.constant 0 : i32
    %c0_i32_1 = arith.constant 0 : i32
    return %c0_i32, %c0_i32_0 : i32, i32
  }
  func.func @transform_4(%arg0: i32) -> (i32, i32) {
    %c0_i32 = arith.constant 0 : i32
    %c0_i32_0 = arith.constant 0 : i32
    %c0_i32_1 = arith.constant 0 : i32
    return %c0_i32, %c0_i32_0 : i32, i32
  }
  func.func @transform_5(%arg0: i32) -> (i32, i32, i32) {
    %c0_i32 = arith.constant 0 : i32
    %c0_i32_0 = arith.constant 0 : i32
    %c0_i32_1 = arith.constant 0 : i32
    return %arg0, %c0_i32, %c0_i32_0 : i32, i32, i32
  }
}

</mosaic_0001>

<bundles_post_ra>
// kernel: tpu_custom_call.1
= control target key start
LH: loop header
LB: loop body
LE: loop exit
PB: predicated region body
PF: predicated region fallthrough
CT: control target
= control target key end

     0   :  { %10 = vsyncpa [#allocation4], 0  ;;  %s1352_s0 = inlined_call_operand.vmem [shape: f32[2,4,256], index: 0, kind: input, shape index: {}]   ;;  %s1353_s1 = inlined_call_operand.hbm [shape: f32[8,36], index: 1, kind: input, shape index: {}]   ;;  %s1354_s2 = inlined_call_operand.vmem [shape: f32[8,1], index: 2, kind: input, shape index: {}]   ;;  %s1355_s3 = inlined_call_operand.hbm [shape: f32[8,36], index: 3, kind: input, shape index: {}]   ;;  %s1356_s4 = inlined_call_operand.vmem [shape: f32[8,1], index: 4, kind: input, shape index: {}]   ;;  %s1357_s5 = inlined_call_operand.hbm [shape: f32[2,4,256], index: 5, kind: output, shape index: {}]  }
   0x1   :  { %11 = vsyncpa [#allocation7], 0 }
   0x2   :  { %12 = vsyncpa [#allocation5], 0 }
   0x3   :  { %14 = vsyncpa [#allocation5 + $0x1], 0  ;;  %s1055_s18 = smov 0   ;;  %s1057_s19 = smov 0  }
   0x4   :  { %s1059_s20 = smov 0   ;;  %s1061_s21 = smov 0  }
   0x5 LB: > { %s1076_s22 = sadd.s32 4294967295, %s1011_s21   ;;  %s784_s23 = sadd.s32 4294967294, %s1011_s21   ;;  %s1011_s21 = sphi %s1061_s21, %s1372_s21   ;;  %s1007_s20 = sphi %s1059_s20, %s1371_s20   ;;  %s1003_s19 = sphi %s1057_s19, %s1370_s19   ;;  %s999_s18 = sphi %s1055_s18, %s1369_s18  }
   0x6   : > { %s1080_s24 = sadd.s32 1, %s1011_s21   ;;  %s137_s25 = sadd.s32 1, %s1007_s20 }
   0x7   : > { %s134_s26 = ssub.s32 %s1011_s21, %s1080_s24  ;;  %p147_p0 = scmp.ne.s32.totalorder %s1007_s20, %s1003_s19 }
   0x8   : > { %p135_p1 = scmp.eq.s32.totalorder %s134_s26, 0  ;;  %p148_p2 = scmp.eq.s32.totalorder %s1076_s22, 1 }
   0x9   : > { %p153_p3 = scmp.ne.s32.totalorder %s1003_s19, %s999_s18  ;;  %p154_p4 = scmp.eq.s32.totalorder %s784_s23, 1 }
   0xa   : > { %s1091_s27 = scalar_select %p135_p1, %s1007_s20, %s137_s25  }
   0xb   : > { %p1093_p5 = por %p148_p2, %p147_p0  ;;  %p1097_p6 = por %p154_p4, %p153_p3 }
   0xc   : > { %p785_p7 = scmp.ge.s32.totalorder %s1011_s21, 1  ;;  %p161_p8 = scmp.lt.s32.totalorder %s1011_s21, 3 }
   0xd   : > { %p831_p9 = scmp.eq.s32.totalorder %s1076_s22, 0  ;;  %s173_s8 = sshll.u32 %s1353_s1, 4  ;;  %s174_s8 = int_to_ptr.hbm [resolvable:$true] %s173_s8 }
   0xe   : > { %p1104_p10 = pnand %p785_p7, %p161_p8  ;;  %s1013_s9 = smov [#allocation3]  }
   0xf   : > { %s175_s10 = sshll.u32 %s1013_s9, 4  ;;  %s188_s13 = sshll.u32 %s1355_s3, 4  ;;  %s176_s10 = int_to_ptr.vmem [resolvable:$true] %s175_s10  ;;  %s189_s13 = int_to_ptr.hbm [resolvable:$true] %s188_s13 }
  0x10   : > { %p820_p11 = pneg %p1104_p10  ;;  %s1014_s14 = smov [#allocation6]  }
  0x11   : > { %s190_s15 = sshll.u32 %s1014_s14, 4  ;;  %214 = sbr.rel (%p1104_p10) target bundleno = 654 (0x28e), region = 40  ;;  %s191_s15 = int_to_ptr.vmem [resolvable:$true] %s190_s15 }
  0x12   : > { %p821_p12 = pnand %p831_p9, %p820_p11 }
  0x14   : > { %823 = dma.hbm_to_vmem [thread:$0]  (!%p821_p12), %s174_s8, 128, %s176_s10, [#allocation4]  }
  0x15   : > { %826 = dma.hbm_to_vmem [thread:$0]  (!%p821_p12), %s189_s13, 128, %s191_s15, [#allocation7]  }
  0x16   : > { %986 = dma.done.wait (%p831_p9), [#allocation4], 128  }
  0x17   : > { %988 = vsyncadd (%p831_p9), [#allocation4], 4294967168 }
  0x18   : > { %990 = dma.done.wait (%p831_p9), [#allocation7], 128  }
  0x19   : > { %992 = vsyncadd (%p831_p9), [#allocation7], 4294967168  ;;  %v1015_v0 = vmov 0.0   ;;  %s1016_s16 = smov 127   ;;  %s1017_s17 = smov 111   ;;  %v254_v7 = vlaneseq  ;;  %vm388_vm0 = vcmask 924672  }
  0x1a   : > { %365 = vrot.lane.b32.xlu1 %v1015_v0, %s1016_s16  ;;  %414 = vrot.lane.b32.xlu0 %v1015_v0, %s1017_s17  ;;  %p248_p13 = scmp.lt.s32.totalorder %s1076_s22, 1  ;;  %s1018_s23 = smov 113   ;;  %v307_v1 = vrot.slane %v1015_v0, 4  ;;  %vm367_vm2 = vcmask 1039360   ;;  %vm416_vm3 = vcmask 908288   ;;  %vm403_vm6 = vcmask 916480  }
  0x1b   : > { %386 = vrot.lane.b32.xlu2 %v1015_v0, %s1018_s23  ;;  %s1019_s8 = smov 112   ;;  %s1020_s9 = smov 1   ;;  %v255_v9 = vand.u32 127, %v254_v7  ;;  %vm446_vm7 = vcmask 1043456   ;;  %vm344_vm8 = vcmask 7168   ;;  %vm316_vm9 = vcmask 130048  }
  0x1c   : > { %s249_s25 = scalar_select %p248_p13, %s1076_s22, 1  ;;  %v436_v58 = vld [vmem:[%s1354_s2] sm:$0xff]  ;;  %v1024_v59 = vmov 0   ;;  %vm329_vm11 = vcmask 121856   ;;  %vm298_vm12 = vcmask 138240   ;;  %vm442_vm13 = vcmask 293888  }
  0x1d   : > { %s1021_s10 = smov 15   ;;  %s1022_s11 = smov 17   ;;  %v256_v10 = vadd.s32 128, %v255_v9  ;;  %v261_v21 = vand.u32 15, %v255_v9  ;;  %880 = vset.pattern.permute.xlu0 %v1024_v59  ;;  %v615_v22 = vld [vmem:[#allocation6] sm:$0xff] }
  0x1e   : > { %s808_s26 = sshll.u32 %s249_s25, 3  ;;  %s1023_s12 = smov 16  }
  0x1f   : > { %s252_s7 = scalar_lea.vmem %s1352_s0, %s808_s26  ;;  %v268_v12 = vand.u32 15, %v256_v10  ;;  %vm1183_vm5 = vcmp.le.s32.totalorder %v261_v21, 14  ;;  %vm1210_vm10 = vcmp.ge.s32.totalorder %v261_v21, 1  ;;  %s809_s25 = sshll.u32 %s1076_s22, 3 }
  0x20   : > { %v253_v2 = vld [vmem:[%s252_s7] sm:$0xff]  ;;  %s698_s6 = scalar_lea.hbm %s1357_s5, %s809_s25  ;;  %s961_s14 = scalar_lea.hbm %s1357_s5, 16 }
  0x21   : > { %286 = vst [vmem:[#allocation1] ss:$2 sm:$0xff] %v253_v2  ;;  %vm1161_vm1 = vcmp.ge.s32.totalorder %v268_v12, 1  ;;  %vm1175_vm4 = vcmp.le.s32.totalorder %v268_v12, 14 }
  0x23   : > { %401 = vrot.lane.b32.xlu2 %v307_v1, %s1019_s8 }
  0x28   : > { %v288_v3 = vld.sshfl [vmem:[#allocation1 + $0x8] sm:$0xff pattern:$0x75316420]  ;;  %v287_v4 = vld.sshfl [vmem:[#allocation1] sm:$0xff pattern:$0x75316420] }
  0x29   : > { %363 = vrot.lane.b32.xlu1 %v288_v3, %s1016_s16  ;;  %360 = vst [vmem:[#allocation2 + $0x28] sm:$0xf] %v288_v3  ;;  %412 = vrot.lane.b32.xlu0 %v288_v3, %s1017_s17  ;;  %v309_v5 = vrot.slane %v288_v3, 4  ;;  %v308_v6 = vrot.slane %v287_v4, 4 }
  0x2a   : > { %359 = vst [vmem:[#allocation2 + $0x48] sm:$0xf] %v287_v4 }
  0x2b   : > { %673 = vst [vmem:[#allocation1] ss:$2 sm:$0xff] %v253_v2  ;;  %384 = vrot.lane.b32.xlu2 %v288_v3, %s1018_s23 }
  0x31   : > { %399 = vrot.lane.b32.xlu1 %v309_v5, %s1019_s8  ;;  %410 = vrot.lane.b32.xlu0 %v287_v4, %s1017_s17 }
  0x33   : > { %361 = vrot.lane.b32.xlu2 %v287_v4, %s1016_s16 }
  0x39   : > { %342 = vrot.lane.b32.xlu1 %v288_v3, %s1020_s9  ;;  %340 = vrot.lane.b32.xlu0 %v287_v4, %s1020_s9 }
  0x3b   : > { %325 = vrot.lane.b32.xlu2 %v287_v4, %s1021_s10 }
  0x41   : > { %382 = vrot.lane.b32.xlu0 %v287_v4, %s1018_s23  ;;  %397 = vrot.lane.b32.xlu1 %v308_v6, %s1019_s8 }
  0x43   : > { %294 = vrot.lane.b32.xlu2 %v287_v4, %s1022_s11 }
  0x49   : > { %327 = vrot.lane.b32.xlu0 %v288_v3, %s1021_s10  ;;  %338 = vrot.lane.b32.xlu1 %v1015_v0, %s1020_s9 }
  0x4b   : > { %312 = vrot.lane.b32.xlu2 %v308_v6, %s1023_s12 }
  0x51   : > { %296 = vrot.lane.b32.xlu0 %v288_v3, %s1022_s11  ;;  %323 = vrot.lane.b32.xlu1 %v1015_v0, %s1021_s10 }
  0x53   : > { %310 = vrot.lane.b32.xlu2 %v307_v1, %s1023_s12 }
  0x59   : > { %314 = vrot.lane.b32.xlu0 %v309_v5, %s1023_s12  ;;  %292 = vrot.lane.b32.xlu1 %v1015_v0, %s1022_s11 }
  0x61   : > { %439 = vperm.xlu0 %880, %v436_v58  }
  0x75   : > { %v1157_v8 = vpop.permute.xlu2 %386 }
  0x7d   : > { %v1159_v11 = vpop.permute.xlu2 %401 }
  0x85   : > { %v385_v14 = vpop.permute.xlu2 %384 }
  0x86   : > { %v390_v15 = vsel %vm388_vm0, %v385_v14, %v1157_v8 }
  0x87   : > { %v394_v16 = vsel %vm1161_vm1, %v390_v15, 0.0 }
  0x88   : > { %396 = vst [vmem:[#allocation2 + $0x20] sm:$0xf] %v394_v16 }
  0x8c   : > { %v1169_v18 = vpop.permute.xlu1 %365  ;;  %v1171_v19 = vpop.permute.xlu0 %414 }
  0x8d   : > { %v362_v17 = vpop.permute.xlu2 %361 }
  0x95   : > { %v1173_v20 = vpop.permute.xlu2 %325 }
  0x9b   : > { %v364_v23 = vpop.permute.xlu1 %363  ;;  %v413_v24 = vpop.permute.xlu0 %412 }
  0x9c   : > { %v369_v25 = vsel %vm367_vm2, %v364_v23, %v1169_v18  ;;  %v418_v26 = vsel %vm416_vm3, %v413_v24, %v1171_v19  ;;  %v368_v28 = vsel %vm367_vm2, %v362_v17, %v364_v23 }
  0x9d   : > { %v373_v29 = vsel %vm1175_vm4, %v369_v25, 0.0  ;;  %v422_v30 = vsel %vm1175_vm4, %v418_v26, 0.0  ;;  %v372_v31 = vsel %vm1183_vm5, %v368_v28, 0.0  ;;  %v1194_v32 = vpop.permute.xlu2 %294 }
  0x9e   : > { %v377_v33 = vrot.slane %v373_v29, 4  ;;  %424 = vst [vmem:[#allocation2 + $0x38] sm:$0xf] %v422_v30  ;;  %v376_v34 = vrot.slane %v372_v31, 4 }
  0xa0   : > { %381 = vst [vmem:[#allocation2 + $0x28] sm:$0xf0] %v377_v33 }
  0xa1   : > { %380 = vst [vmem:[#allocation2 + $0x48] sm:$0xf0] %v376_v34 }
  0xa3   : > { %v400_v35 = vpop.permute.xlu1 %399  ;;  %v411_v36 = vpop.permute.xlu0 %410 }
  0xa4   : > { %v405_v37 = vsel %vm403_vm6, %v400_v35, %v1159_v11  ;;  %v417_v38 = vsel %vm416_vm3, %v411_v36, %v413_v24  ;;  %v435_v24 = vld [vmem:[#allocation3] sm:$0xff] }
  0xa5   : > { %409 = vst [vmem:[#allocation2 + $0x20] sm:$0xf0] %v405_v37  ;;  %v421_v39 = vsel %vm1183_vm5, %v417_v38, 0.0  ;;  %v434_v40 = vld [vmem:[#allocation2 + $0x38] sm:$0xf]  ;;  %v313_v41 = vpop.permute.xlu2 %312 }
  0xa6   : > { %423 = vst [vmem:[#allocation2 + $0x40] sm:$0xf] %v421_v39  ;;  %797 = vmatpush.msk.msra.mxu1 %vm446_vm7, %v434_v40  ;;  %v616_v37 = vld [vmem:[%s1356_s4] sm:$0xff] }
  0xa7   : > { %v430_v46 = vld [vmem:[#allocation2 + $0x28] sm:$0xff] }
  0xa8   : > { %v429_v4 = vld [vmem:[#allocation2 + $0x48] sm:$0xff] }
  0xab   : > { %v343_v42 = vpop.permute.xlu1 %342  ;;  %v341_v43 = vpop.permute.xlu0 %340 }
  0xac   : > { %v346_v44 = vsel %vm344_vm8, %v341_v43, %v343_v42  ;;  %v432_v45 = vld [vmem:[#allocation2 + $0x20] sm:$0xff] }
  0xad   : > { %v350_v47 = vsel %vm1161_vm1, %v346_v44, 0.0  ;;  %485 = vmatpush.msra.mxu1 %v432_v45  ;;  %v433_v48 = vld [vmem:[#allocation2 + $0x40] sm:$0xf]  ;;  %v1205_v49 = vpop.permute.xlu2 %310 }
  0xae   : > { %v354_v50 = vrot.slane %v350_v47, 4  ;;  %795 = vmatpush.msk.msra.mxu0 %vm446_vm7, %v433_v48  ;;  %v317_v51 = vsel %vm316_vm9, %v1205_v49, %v313_v41 }
  0xaf   : > { %486 = vmatpush.msra.mxu1 %v430_v46  ;;  %321 = vst [vmem:[#allocation2 + $0x30] sm:$0xf0] %v317_v51 }
  0xb0   : > { %358 = vst [vmem:[#allocation2 + $0x10] sm:$0xf0] %v354_v50 }
  0xb3   : > { %v383_v53 = vpop.permute.xlu0 %382  ;;  %v398_v54 = vpop.permute.xlu1 %397 }
  0xb4   : > { %v389_v55 = vsel %vm388_vm0, %v383_v53, %v385_v14  ;;  %v404_v56 = vsel %vm403_vm6, %v398_v54, %v400_v35 }
  0xb5   : > { %v393_v57 = vsel %vm1210_vm10, %v389_v55, 0.0  ;;  %408 = vst [vmem:[#allocation2 + $0x8] sm:$0xf0] %v404_v56 }
  0xb6   : > { %395 = vst [vmem:[#allocation2 + $0x8] sm:$0xf] %v393_v57 }
  0xbb   : > { %v328_v60 = vpop.permute.xlu0 %327  ;;  %v1221_v61 = vpop.permute.xlu1 %338 }
  0xbc   : > { %v331_v62 = vsel %vm329_vm11, %v1173_v20, %v328_v60  ;;  %v345_v63 = vsel %vm344_vm8, %v1221_v61, %v341_v43 }
  0xbd   : > { %v335_v0 = vsel %vm1175_vm4, %v331_v62, 0.0  ;;  %v349_v1 = vsel %vm1210_vm10, %v345_v63, 0.0  ;;  %v431_v2 = vld [vmem:[#allocation2 + $0x8] sm:$0xff] }
  0xbe   : > { %337 = vst [vmem:[#allocation2 + $0x10] sm:$0xf] %v335_v0  ;;  %v353_v3 = vrot.slane %v349_v1, 4  ;;  %465 = vmatpush.msra.mxu0 %v431_v2 }
  0xc0   : > { %357 = vst [vmem:[#allocation2 + $0x18] sm:$0xf0] %v353_v3  ;;  %466 = vmatpush.msra.mxu0 %v429_v4 }
  0xc3   : > { %v297_v5 = vpop.permute.xlu0 %296  ;;  %v1231_v6 = vpop.permute.xlu1 %323 }
  0xc4   : > { %v300_v7 = vsel %vm298_vm12, %v1194_v32, %v297_v5  ;;  %v330_v9 = vsel %vm329_vm11, %v1231_v6, %v1173_v20 }
  0xc5   : > { %v304_v10 = vsel %vm1161_vm1, %v300_v7, 0.0  ;;  %v334_v12 = vsel %vm1183_vm5, %v330_v9, 0.0  ;;  %v428_v14 = vld [vmem:[#allocation2 + $0x10] sm:$0xff] }
  0xc6   : > { %306 = vst [vmem:[#allocation2] sm:$0xf] %v304_v10  ;;  %487 = vmatpush.msra.mxu1 %v428_v14 }
  0xc7   : > { %336 = vst [vmem:[#allocation2 + $0x18] sm:$0xf] %v334_v12 }
  0xcb   : > { %v315_v15 = vpop.permute.xlu0 %314  ;;  %v293_v16 = vpop.permute.xlu1 %292 }
  0xcc   : > { %v318_v17 = vsel %vm316_vm9, %v313_v41, %v315_v15  ;;  %v299_v21 = vsel %vm298_vm12, %v293_v16, %v1194_v32 }
  0xcd   : > { %322 = vst [vmem:[#allocation2] sm:$0xf0] %v318_v17  ;;  %v303_v20 = vsel %vm1210_vm10, %v299_v21, 0.0 }
  0xce   : > { %305 = vst [vmem:[#allocation2 + $0x30] sm:$0xf] %v303_v20  ;;  %v427_v23 = vld [vmem:[#allocation2 + $0x18] sm:$0xff] }
  0xcf   : > { %467 = vmatpush.msra.mxu0 %v427_v23 }
  0xd3   : > { %v440_v28 = vpop.permute.xlu0 %439 }
  0xd4   : > { %v426_v25 = vld [vmem:[#allocation2] sm:$0xff] }
  0xd5   : > { %488 = vmatpush.msra.mxu1 %v426_v25  ;;  %v425_v26 = vld [vmem:[#allocation2 + $0x30] sm:$0xff] }
  0xd6   : > { %468 = vmatpush.msra.mxu0 %v425_v26  ;;  %798 = vmatmul.msk.f32.vlgmr.msra.gmra.mxu1 %vm442_vm13, %v435_v24 }
  0xd7   : > { %796 = vmatmul.msk.f32.vlgmr.msra.gmra.mxu0 %vm442_vm13, %v435_v24 }
 0x153   : > { %v490_v29 = vpop.f32.mrf.mxu1 }
 0x154   : > { %v491_v30 = vadd.f32 %v490_v29, %v440_v28  ;;  %v470_v31 = vpop.f32.mrf.mxu0 }
 0x155   : > { %v471_v32 = vadd.f32 %v470_v31, %v440_v28 }
 0x156   : > { %v494_v33 = vmax.f32 %v491_v30, 0.0 }
 0x157   : > { %v493_v34 = vmax.f32 %v471_v32, 0.0 }
 0x158   : > { %552 = vst [vmem:[#allocation2 + $0x28] sm:$0xf] %v494_v33  ;;  %555 = vrot.lane.b32.xlu2 %v494_v33, %s1016_s16  ;;  %595 = vrot.lane.b32.xlu1 %v494_v33, %s1017_s17  ;;  %v510_v35 = vrot.slane %v494_v33, 4 }
 0x159   : > { %551 = vst [vmem:[#allocation2 + $0x48] sm:$0xf] %v493_v34  ;;  %553 = vrot.lane.b32.xlu0 %v493_v34, %s1016_s16  ;;  %v509_v36 = vrot.slane %v493_v34, 4 }
 0x160   : > { %573 = vrot.lane.b32.xlu1 %v494_v33, %s1018_s23  ;;  %593 = vrot.lane.b32.xlu2 %v493_v34, %s1017_s17  ;;  %s245_s17 = sand.u32 1, %s1003_s19  }
 0x161   : > { %521 = vrot.lane.b32.xlu0 %v493_v34, %s1021_s10  ;;  %s687_s22 = scalar_lea.sflag [#allocation5], %s245_s17 }
 0x168   : > { %533 = vrot.lane.b32.xlu1 %v493_v34, %s1020_s9  ;;  %535 = vrot.lane.b32.xlu2 %v494_v33, %s1020_s9  ;;  %s702_s9 = sshll.u32 %s698_s6, 4  ;;  %s703_s9 = int_to_ptr.hbm [resolvable:$true] %s702_s9 }
 0x169   : > { %585 = vrot.lane.b32.xlu0 %v510_v35, %s1019_s8 }
 0x170   : > { %571 = vrot.lane.b32.xlu1 %v493_v34, %s1018_s23  ;;  %497 = vrot.lane.b32.xlu2 %v493_v34, %s1022_s11  ;;  %s792_s23 = sshll.u32 %s245_s17, 3 }
 0x171   : > { %499 = vrot.lane.b32.xlu0 %v494_v33, %s1022_s11  ;;  %s247_s7 = scalar_lea.vmem [#allocation8], %s792_s23 }
 0x178   : > { %523 = vrot.lane.b32.xlu1 %v494_v33, %s1021_s10  ;;  %583 = vrot.lane.b32.xlu2 %v509_v36, %s1019_s8  ;;  %s700_s8 = sshll.u32 %s247_s7, 4  ;;  %s955_s10 = sshra.s32 %s703_s9, 4  ;;  %s701_s8 = int_to_ptr.vmem [resolvable:$true] %s700_s8  ;;  %s956_s10 = int_to_ptr.hbm [resolvable:$true] %s955_s10 }
 0x179   : > { %619 = vperm.xlu0 %880, %v616_v37   ;;  %s957_s11 = scalar_lea.hbm %s956_s10, 8  ;;  %p962_p3 = scmp.lt.s32.totalorder %s956_s10, %s1357_s5 }
 0x17a   : > { %p958_p0 = scmp.ne.s32.totalorder %s956_s10, %s957_s11  ;;  %p963_p4 = scmp.lt.s32.totalorder %s961_s14, %s957_s11 }
 0x17c   : > { %p959_p1 = pnand %p958_p0, %p1093_p5  ;;  %p964_p7 = por %p963_p4, %p962_p3 }
 0x17e   : > { %p960_p2 = pneg %p959_p1 }
 0x180   : > { %511 = vrot.lane.b32.xlu1 %v509_v36, %s1023_s12  ;;  %513 = vrot.lane.b32.xlu2 %v510_v35, %s1023_s12  ;;  %p965_p8 = pnand %p964_p7, %p960_p2 }
 0x1b2   : > { %v556_v38 = vpop.permute.xlu2 %555 }
 0x1b3   : > { %v558_v39 = vsel %vm367_vm2, %v556_v38, %v1169_v18 }
 0x1b4   : > { %v562_v40 = vsel %vm1175_vm4, %v558_v39, 0.0 }
 0x1b5   : > { %v566_v41 = vrot.slane %v562_v40, 4 }
 0x1b7   : > { %570 = vst [vmem:[#allocation2 + $0x28] sm:$0xf0] %v566_v41  ;;  %v674_v41 = vld.sshfl [vmem:[#allocation1] sm:$0xff pattern:$0x75316420] }
 0x1ba   : > { %v594_v42 = vpop.permute.xlu2 %593 }
 0x1be   : > { %v610_v21 = vld [vmem:[#allocation2 + $0x28] sm:$0xff] }
 0x1c2   : > { %v536_v43 = vpop.permute.xlu2 %535 }
 0x1ca   : > { %v498_v44 = vpop.permute.xlu2 %497  ;;  %v596_v45 = vpop.permute.xlu1 %595 }
 0x1cb   : > { %v501_v46 = vsel %vm298_vm12, %v293_v16, %v498_v44  ;;  %v597_v47 = vsel %vm416_vm3, %v594_v42, %v596_v45  ;;  %v598_v48 = vsel %vm416_vm3, %v596_v45, %v1171_v19  ;;  %v554_v50 = vpop.permute.xlu0 %553 }
 0x1cc   : > { %v505_v18 = vsel %vm1210_vm10, %v501_v46, 0.0  ;;  %v601_v51 = vsel %vm1183_vm5, %v597_v47, 0.0  ;;  %v602_v53 = vsel %vm1175_vm4, %v598_v48, 0.0  ;;  %v557_v54 = vsel %vm367_vm2, %v554_v50, %v556_v38  ;;  %v675_v38 = vld.sshfl [vmem:[#allocation1 + $0x8] sm:$0xff pattern:$0x75316420] }
 0x1cd   : > { %507 = vst [vmem:[#allocation2 + $0x30] sm:$0xf] %v505_v18  ;;  %v561_v55 = vsel %vm1183_vm5, %v557_v54, 0.0 }
 0x1ce   : > { %603 = vst [vmem:[#allocation2 + $0x40] sm:$0xf] %v601_v51  ;;  %v565_v56 = vrot.slane %v561_v55, 4 }
 0x1cf   : > { %604 = vst [vmem:[#allocation2 + $0x38] sm:$0xf] %v602_v53 }
 0x1d0   : > { %569 = vst [vmem:[#allocation2 + $0x48] sm:$0xf0] %v565_v56 }
 0x1d2   : > { %v574_v19 = vpop.permute.xlu1 %573 }
 0x1d3   : > { %v576_v57 = vsel %vm388_vm0, %v574_v19, %v1157_v8  ;;  %v522_v58 = vpop.permute.xlu0 %521  ;;  %v584_v8 = vpop.permute.xlu2 %583 }
 0x1d4   : > { %v580_v59 = vsel %vm1161_vm1, %v576_v57, 0.0  ;;  %v525_v60 = vsel %vm329_vm11, %v1231_v6, %v522_v58 }
 0x1d5   : > { %582 = vst [vmem:[#allocation2 + $0x20] sm:$0xf] %v580_v59  ;;  %v529_v62 = vsel %vm1183_vm5, %v525_v60, 0.0  ;;  %v613_v63 = vld [vmem:[#allocation2 + $0x40] sm:$0xf] }
 0x1d6   : > { %531 = vst [vmem:[#allocation2 + $0x18] sm:$0xf] %v529_v62  ;;  %799 = vmatpush.msk.msra.mxu2 %vm446_vm7, %v613_v63  ;;  %v614_v0 = vld [vmem:[#allocation2 + $0x38] sm:$0xf] }
 0x1d7   : > { %801 = vmatpush.msk.msra.mxu3 %vm446_vm7, %v614_v0  ;;  %v609_v52 = vld [vmem:[#allocation2 + $0x48] sm:$0xff] }
 0x1da   : > { %v534_v1 = vpop.permute.xlu1 %533 }
 0x1db   : > { %v537_v2 = vsel %vm344_vm8, %v1221_v61, %v534_v1  ;;  %v538_v3 = vsel %vm344_vm8, %v534_v1, %v536_v43  ;;  %v586_v4 = vpop.permute.xlu0 %585  ;;  %v514_v13 = vpop.permute.xlu2 %513 }
 0x1dc   : > { %v541_v5 = vsel %vm1210_vm10, %v537_v2, 0.0  ;;  %v542_v27 = vsel %vm1161_vm1, %v538_v3, 0.0  ;;  %v587_v6 = vsel %vm403_vm6, %v584_v8, %v586_v4  ;;  %v588_v7 = vsel %vm403_vm6, %v586_v4, %v1159_v11 }
 0x1dd   : > { %v545_v9 = vrot.slane %v541_v5, 4  ;;  %v546_v10 = vrot.slane %v542_v27, 4  ;;  %591 = vst [vmem:[#allocation2 + $0x8] sm:$0xf0] %v587_v6 }
 0x1de   : > { %592 = vst [vmem:[#allocation2 + $0x20] sm:$0xf0] %v588_v7 }
 0x1df   : > { %549 = vst [vmem:[#allocation2 + $0x18] sm:$0xf0] %v545_v9 }
 0x1e0   : > { %550 = vst [vmem:[#allocation2 + $0x10] sm:$0xf0] %v546_v10 }
 0x1e2   : > { %v572_v61 = vpop.permute.xlu1 %571 }
 0x1e3   : > { %v575_v12 = vsel %vm388_vm0, %v572_v61, %v574_v19  ;;  %v500_v14 = vpop.permute.xlu0 %499 }
 0x1e4   : > { %v579_v15 = vsel %vm1210_vm10, %v575_v12, 0.0  ;;  %v502_v16 = vsel %vm298_vm12, %v498_v44, %v500_v14 }
 0x1e5   : > { %581 = vst [vmem:[#allocation2 + $0x8] sm:$0xf] %v579_v15  ;;  %v506_v17 = vsel %vm1161_vm1, %v502_v16, 0.0  ;;  %v612_v11 = vld [vmem:[#allocation2 + $0x20] sm:$0xff] }
 0x1e6   : > { %508 = vst [vmem:[#allocation2] sm:$0xf] %v506_v17  ;;  %663 = vmatpush.msra.mxu3 %v612_v11  ;;  %v607_v26 = vld [vmem:[#allocation2 + $0x18] sm:$0xff] }
 0x1e8   : > { %664 = vmatpush.msra.mxu3 %v610_v21 }
 0x1ea   : > { %v524_v20 = vpop.permute.xlu1 %523 }
 0x1eb   : > { %v526_v23 = vsel %vm329_vm11, %v522_v58, %v524_v20  ;;  %v620_v34 = vpop.permute.xlu0 %619 }
 0x1ec   : > { %v530_v24 = vsel %vm1175_vm4, %v526_v23, 0.0  ;;  %v611_v25 = vld [vmem:[#allocation2 + $0x8] sm:$0xff] }
 0x1ed   : > { %532 = vst [vmem:[#allocation2 + $0x10] sm:$0xf] %v530_v24  ;;  %643 = vmatpush.msra.mxu2 %v611_v25 }
 0x1ef   : > { %644 = vmatpush.msra.mxu2 %v609_v52 }
 0x1f1   : > { %645 = vmatpush.msra.mxu2 %v607_v26 }
 0x1f2   : > { %v512_v28 = vpop.permute.xlu1 %511 }
 0x1f3   : > { %v515_v29 = vsel %vm316_vm9, %v1205_v49, %v512_v28  ;;  %v516_v30 = vsel %vm316_vm9, %v512_v28, %v514_v13 }
 0x1f4   : > { %519 = vst [vmem:[#allocation2 + $0x30] sm:$0xf0] %v515_v29  ;;  %v608_v31 = vld [vmem:[#allocation2 + $0x10] sm:$0xff] }
 0x1f5   : > { %520 = vst [vmem:[#allocation2] sm:$0xf0] %v516_v30  ;;  %665 = vmatpush.msra.mxu3 %v608_v31 }
 0x1fb   : > { %v605_v32 = vld [vmem:[#allocation2 + $0x30] sm:$0xff] }
 0x1fc   : > { %646 = vmatpush.msra.mxu2 %v605_v32  ;;  %v606_v33 = vld [vmem:[#allocation2] sm:$0xff] }
 0x1fd   : > { %666 = vmatpush.msra.mxu3 %v606_v33  ;;  %800 = vmatmul.msk.f32.vlgmr.msra.gmra.mxu2 %vm442_vm13, %v615_v22 }
 0x1fe   : > { %802 = vmatmul.msk.f32.vlgmr.msra.gmra.mxu3 %vm442_vm13, %v615_v22 }
 0x280   : > { %v648_v35 = vpop.f32.mrf.mxu2 }
 0x281   : > { %v649_v49 = vadd.f32 %v648_v35, %v620_v34  ;;  %v668_v36 = vpop.f32.mrf.mxu3 }
 0x282   : > { %v669_v37 = vadd.f32 %v668_v36, %v620_v34 }
 0x283   : > { %v671_v39 = vmul.f32 0.1, %v649_v49 }
 0x284   : > { %v672_v40 = vmul.f32 0.1, %v669_v37 }
 0x285   : > { %v678_v43 = vadd.f32 %v674_v41, %v671_v39 }
 0x286   : > { %v679_v42 = vadd.f32 %v675_v38, %v672_v40 }
 0x288   : > { %v682_v44 = vrot.slane %v679_v42, 4 }
 0x28a   : > { %v683_v45 = vsel %vm446_vm7, %v678_v43, %v682_v44 }
 0x28b   : > { %685 = vst [vmem:[%s247_s7] sm:$0xff] %v683_v45 }
 0x28c   : > { %968 = shalt.err (!%p965_p8)
}
 0x28d   : > { %818 = dma.vmem_to_hbm [thread:$0]  (%p1093_p5), %s701_s8, 128, %s703_s9, %s687_s22  }
 0x28e PF: > { %p835_p9 = scmp.ge.s32.totalorder %s1011_s21, 2  ;;  %s714_s17 = sand.u32 1, %s999_s18  }
 0x28f   : > { %s715_s23 = scalar_lea.sflag [#allocation5], %s714_s17 }
 0x290   : > { %p828_p10 = pnand %p835_p9, %p1097_p6 }
 0x292   : > { %p829_p11 = pneg %p828_p10 }
 0x294   : > { %994 = dma.done.wait (%p829_p11), %s715_s23, 128  }
 0x295   : > { %996 = vsyncadd (%p829_p11), %s715_s23, 4294967168  ;;  %p17_p12 = scmp.ge.s32.totalorder %s1080_s24, 4   ;;  %s1369_s18 = smov %s1003_s19 }
 0x296   : > { %s1370_s19 = smov %s1007_s20  ;;  %s1371_s20 = smov %s1091_s27 }
 0x297   : > { %s1372_s21 = smov %s1080_s24  ;;  %19 = sbr.rel (!%p17_p12) target bundleno = 5 (0x5), region = 84 }
 0x29c   :  { %721 = vsyncpa [#allocation4], 1 }
 0x29d   :  { %723 = vsyncpa [#allocation4 + $0x1], 1 }
 0x29e   :  { %724 = vsyncpa [#allocation7], 1 }
 0x29f   :  { %725 = vsyncpa [#allocation5], 1 }
 0x2a0   :  { %727 = vsyncpa [#allocation5 + $0x1], 1 }

</bundles_post_ra>
